<compile_context>
chip_gen: v5e
topology: v5e:2x2
jax: 0.10.0
libtpu: 0.0.40
codegen_flags: <defaults>
</compile_context>

<pallas_src>
import jax
import jax.numpy as jnp
from jax.experimental import pallas as pl
from jax.experimental.pallas import tpu as pltpu

PAD = 128  # lane width; K and N of every layer are padded to this


def _make_mlp_kernel(hidden_size):
    """Fused 3-layer MLP forward. Biases are folded into the weight slab as an
    extra K-row, so each layer is one matmul; the 'ones' column that activates
    that row is re-inserted between layers with a cheap VPU select."""

    def kernel(x_ref, w_ref, o_ref):
        # x_ref: (B_pad, PAD)  -- cols [0:in)=x, col in = 1.0, rest 0
        # w_ref: (3, PAD, PAD) -- per-layer [W ; b] padded with zeros
        # o_ref: (B_pad, PAD)  -- col 0 holds sigmoid(logits)
        x = x_ref[...]

        # layer 1: linear_in + relu
        h = jnp.dot(x, w_ref[0], preferred_element_type=jnp.float32)
        h = jnp.maximum(h, 0.0)

        # insert the bias-activation "1" at column `hidden_size` (padded cols
        # past the hidden width are exactly zero, so this is the only fixup).
        col = jax.lax.broadcasted_iota(jnp.int32, h.shape, 1)
        is_bias_col = col == hidden_size
        h = jnp.where(is_bias_col, 1.0, h)

        # layer 2: hidden1 + relu
        h = jnp.dot(h, w_ref[1], preferred_element_type=jnp.float32)
        h = jnp.maximum(h, 0.0)
        h = jnp.where(is_bias_col, 1.0, h)

        # layer 3: hidden2 + sigmoid (EUP)
        h = jnp.dot(h, w_ref[2], preferred_element_type=jnp.float32)
        o_ref[...] = jax.nn.sigmoid(h)

    return kernel


def pack_params(params, input_size, hidden_size, output_size):
    """Pack W1/b1, W2/b2, W3/b3 into one zero-padded (3, PAD, PAD) slab.

    For each layer l the bias is stored as an extra K-row at index K_l
    (13 for layer 1, hidden_size for layers 2/3); the matching input column
    is set to 1, so x_aug @ slab[l] == x @ W_l + b_l.
    """
    assert input_size < PAD and hidden_size < PAD and output_size <= PAD
    w_slab = jnp.zeros((3, PAD, PAD), jnp.float32)
    w_slab = w_slab.at[0, :input_size, :hidden_size].set(params["w1"])
    w_slab = w_slab.at[0, input_size, :hidden_size].set(params["b1"].reshape(-1))
    w_slab = w_slab.at[1, :hidden_size, :hidden_size].set(params["w2"])
    w_slab = w_slab.at[1, hidden_size, :hidden_size].set(params["b2"].reshape(-1))
    w_slab = w_slab.at[2, :hidden_size, :output_size].set(params["w3"])
    w_slab = w_slab.at[2, hidden_size, :output_size].set(params["b3"].reshape(-1))
    return w_slab


def classification_forward(x, w_slab, *, input_size, hidden_size, output_size):
    """x: (B, input_size) float32; w_slab: (3, PAD, PAD) packed weights."""
    B = x.shape[0]
    B_pad = ((B + 7) // 8) * 8  # sublane-aligned batch

    # Lane-dense augmented input: [x | 1 | 0-pad] -> (B_pad, PAD)
    x_aug = jnp.zeros((B_pad, PAD), jnp.float32)
    x_aug = x_aug.at[:B, :input_size].set(x)
    x_aug = x_aug.at[:B, input_size].set(1.0)

    flops = 2 * B * (input_size * hidden_size
                     + hidden_size * hidden_size
                     + hidden_size * output_size)
    bytes_accessed = (x_aug.size + w_slab.size + B_pad * PAD) * 4

    vmem = pl.BlockSpec(memory_space=pltpu.MemorySpace.VMEM)
    out_pad = pl.pallas_call(
        _make_mlp_kernel(hidden_size),
        out_shape=jax.ShapeDtypeStruct((B_pad, PAD), jnp.float32),
        in_specs=[vmem, vmem],
        out_specs=vmem,
        cost_estimate=pl.CostEstimate(
            flops=flops,
            transcendentals=B * output_size,
            bytes_accessed=bytes_accessed,
        ),
    )(x_aug, w_slab)

    return out_pad[:B, :output_size]


def init_params(key, input_size, hidden_size, output_size):
    """Deterministic init mimicking nn.Linear's U(-1/sqrt(fan_in), 1/sqrt(fan_in)).

    Weights are stored already transposed to (in_features, out_features);
    biases as (1, out_features).
    """
    def linear(k, fan_in, fan_out):
        kw, kb = jax.random.split(k)
        bound = 1.0 / jnp.sqrt(jnp.float32(fan_in))
        w = jax.random.uniform(kw, (fan_in, fan_out), jnp.float32, -bound, bound)
        b = jax.random.uniform(kb, (1, fan_out), jnp.float32, -bound, bound)
        return w, b

    k1, k2, k3 = jax.random.split(key, 3)
    w1, b1 = linear(k1, input_size, hidden_size)
    w2, b2 = linear(k2, hidden_size, hidden_size)
    w3, b3 = linear(k3, hidden_size, output_size)
    return {"w1": w1, "b1": b1, "w2": w2, "b2": b2, "w3": w3, "b3": b3}


def reference_forward(x, params):
    h = jnp.maximum(x @ params["w1"] + params["b1"], 0.0)
    h = jnp.maximum(h @ params["w2"] + params["b2"], 0.0)
    return jax.nn.sigmoid(h @ params["w3"] + params["b3"])


if __name__ == "__main__":
    # Heart-dataset-style shapes: 13 input features, hidden_size=25, 1 output.
    input_size, hidden_size, output_size = 13, 25, 1
    batch = 8

    key = jax.random.PRNGKey(0)
    k_params, k_x = jax.random.split(key)
    params = init_params(k_params, input_size, hidden_size, output_size)
    w_slab = pack_params(params, input_size, hidden_size, output_size)
    x = jax.random.normal(k_x, (batch, input_size), jnp.float32)

    out = classification_forward(
        x, w_slab,
        input_size=input_size, hidden_size=hidden_size, output_size=output_size)
    out = jax.block_until_ready(out)

    ref = reference_forward(x, params)
    assert out.shape == (batch, output_size)
    assert jnp.allclose(out, ref, atol=1e-5, rtol=1e-5)

    print("KERNEL_OK")
</pallas_src>

<mosaic_0001>
module attributes {stable_mosaic.version = 11 : i64} {
  func.func @kernel(%arg0: memref<8x128xf32, #tpu.memory_space<vmem>>, %arg1: memref<3x128x128xf32, #tpu.memory_space<vmem>>, %arg2: memref<8x128xf32, #tpu.memory_space<vmem>>) attributes {dimension_semantics = [], scalar_prefetch = 0 : i64, scratch_operands = 0 : i64, tpu.core_type = #tpu.core_type<tc>} {
    %c0 = arith.constant 0 : index
    %c0_0 = arith.constant 0 : index
    %0 = vector.load %arg0[%c0, %c0_0] : memref<8x128xf32, #tpu.memory_space<vmem>>, vector<8x128xf32>
    %c0_1 = arith.constant 0 : index
    %c0_2 = arith.constant 0 : index
    %c0_3 = arith.constant 0 : index
    %1 = vector.load %arg1[%c0_1, %c0_2, %c0_3] : memref<3x128x128xf32, #tpu.memory_space<vmem>>, vector<1x128x128xf32>
    %2 = vector.shape_cast %1 : vector<1x128x128xf32> to vector<128x128xf32>
    %cst = arith.constant dense<0.000000e+00> : vector<8x128xf32>
    %3 = tpu.matmul %0, %2, %cst {dimension_numbers = #tpu.dot_dimension_numbers<[1], [0], [0], [1], [0, 0, 1, 1], [], []>} : vector<8x128xf32>, vector<128x128xf32>, vector<8x128xf32> -> vector<8x128xf32>
    %cst_4 = arith.constant 0.000000e+00 : f32
    %4 = vector.broadcast %cst_4 : f32 to vector<8x128xf32>
    %5 = arith.maximumf %3, %4 : vector<8x128xf32>
    %6 = tpu.iota {dimensions = array<i32: 1>} : vector<8x128xi32>
    %c25_i32 = arith.constant 25 : i32
    %7 = vector.broadcast %c25_i32 : i32 to vector<8x128xi32>
    %8 = arith.cmpi eq, %6, %7 : vector<8x128xi32>
    %cst_5 = arith.constant 1.000000e+00 : f32
    %9 = vector.broadcast %cst_5 : f32 to vector<8x128xf32>
    %10 = arith.select %8, %9, %5 : vector<8x128xi1>, vector<8x128xf32>
    %c1 = arith.constant 1 : index
    %c0_6 = arith.constant 0 : index
    %c0_7 = arith.constant 0 : index
    %11 = vector.load %arg1[%c1, %c0_6, %c0_7] : memref<3x128x128xf32, #tpu.memory_space<vmem>>, vector<1x128x128xf32>
    %12 = vector.shape_cast %11 : vector<1x128x128xf32> to vector<128x128xf32>
    %cst_8 = arith.constant dense<0.000000e+00> : vector<8x128xf32>
    %13 = tpu.matmul %10, %12, %cst_8 {dimension_numbers = #tpu.dot_dimension_numbers<[1], [0], [0], [1], [0, 0, 1, 1], [], []>} : vector<8x128xf32>, vector<128x128xf32>, vector<8x128xf32> -> vector<8x128xf32>
    %cst_9 = arith.constant 0.000000e+00 : f32
    %14 = vector.broadcast %cst_9 : f32 to vector<8x128xf32>
    %15 = arith.maximumf %13, %14 : vector<8x128xf32>
    %cst_10 = arith.constant 1.000000e+00 : f32
    %16 = vector.broadcast %cst_10 : f32 to vector<8x128xf32>
    %17 = arith.select %8, %16, %15 : vector<8x128xi1>, vector<8x128xf32>
    %c2 = arith.constant 2 : index
    %c0_11 = arith.constant 0 : index
    %c0_12 = arith.constant 0 : index
    %18 = vector.load %arg1[%c2, %c0_11, %c0_12] : memref<3x128x128xf32, #tpu.memory_space<vmem>>, vector<1x128x128xf32>
    %19 = vector.shape_cast %18 : vector<1x128x128xf32> to vector<128x128xf32>
    %cst_13 = arith.constant dense<0.000000e+00> : vector<8x128xf32>
    %20 = tpu.matmul %17, %19, %cst_13 {dimension_numbers = #tpu.dot_dimension_numbers<[1], [0], [0], [1], [0, 0, 1, 1], [], []>} : vector<8x128xf32>, vector<128x128xf32>, vector<8x128xf32> -> vector<8x128xf32>
    %21 = arith.negf %20 : vector<8x128xf32>
    %22 = math.exp %21 : vector<8x128xf32>
    %cst_14 = arith.constant 1.000000e+00 : f32
    %23 = vector.broadcast %cst_14 : f32 to vector<8x128xf32>
    %24 = arith.addf %23, %22 : vector<8x128xf32>
    %25 = arith.divf %23, %24 : vector<8x128xf32>
    %c0_15 = arith.constant 0 : index
    %c0_16 = arith.constant 0 : index
    %26 = vector.load %arg2[%c0_15, %c0_16] : memref<8x128xf32, #tpu.memory_space<vmem>>, vector<8x128xf32>
    tpu.vector_store %arg2[%c0_15, %c0_16], %25 {strides = array<i32>} : memref<8x128xf32, #tpu.memory_space<vmem>>, vector<8x128xf32>,
    return
  }
}

</mosaic_0001>

<bundles_post_ra>
// kernel: tpu_custom_call.1
= control target key start
LH: loop header
LB: loop body
LE: loop exit
PB: predicated region body
PF: predicated region fallthrough
CT: control target
= control target key end

     0   :  { %7 = vsyncpa [#allocation3], 0  ;;  %s315_s0 = inlined_call_operand.hbm [shape: f32[8,128], index: 0, kind: input, shape index: {}]   ;;  %s316_s1 = inlined_call_operand.hbm [shape: f32[3,128,128], index: 1, kind: input, shape index: {}]   ;;  %s317_s2 = inlined_call_operand.hbm [shape: f32[8,128], index: 2, kind: output, shape index: {}]  }
   0x1   :  { %8 = vsyncpa [#allocation6], 0 }
   0x2   :  { %9 = vsyncpa [#allocation4], 0  ;;  %s15_s11 = sshll.u32 %s315_s0, 4  ;;  %s286_s12 = smov [#allocation2]   ;;  %s16_s11 = int_to_ptr.hbm [resolvable:$true] %s15_s11 }
   0x3   :  { %s17_s13 = sshll.u32 %s286_s12, 4  ;;  %s25_s16 = sshll.u32 %s316_s1, 4  ;;  %s18_s13 = int_to_ptr.vmem [resolvable:$true] %s17_s13  ;;  %s26_s16 = int_to_ptr.hbm [resolvable:$true] %s25_s16 }
   0x4   :  { %20 = dma.hbm_to_vmem [thread:$0]  %s16_s11, 128, %s18_s13, [#allocation3]  }
   0x5   :  { %s287_s17 = smov [#allocation5]   ;;  %s288_s19 = smov 128  }
   0x6   :  { %s27_s18 = sshll.u32 %s287_s17, 4  ;;  %s289_s20 = smov 8   ;;  %s28_s18 = int_to_ptr.vmem [resolvable:$true] %s27_s18 }
   0x7   :  { %33 = dma.hbm_to_vmem [thread:$0]  %s26_s16, 6144, %s28_s18, [#allocation6], %s288_s19, %s288_s19, %s289_s20  }
   0x8   :  { %280 = dma.done.wait [#allocation3], 128  }
   0x9   :  { %281 = vsyncadd [#allocation3], 4294967168 }
   0xa   :  { %282 = dma.done.wait [#allocation6], 6144  }
   0xb   :  { %283 = vsyncadd [#allocation6], 4294961152  ;;  %v58_v0 = vld [vmem:[#allocation5 + $0x78] sm:$0xff]  ;;  %v57_v1 = vld [vmem:[#allocation5 + $0x70] sm:$0xff]  ;;  %v80_v44 = vlaneseq  ;;  %s290_s0 = smov [#allocation7]   ;;  %s187_s23 = sshll.u32 %s317_s2, 4  ;;  %s188_s23 = int_to_ptr.hbm [resolvable:$true] %s187_s23 }
   0xc   :  { %59 = vmatpush.msra.mxu0 %v58_v0  ;;  %v56_v2 = vld [vmem:[#allocation5 + $0x68] sm:$0xff]  ;;  %v55_v3 = vld [vmem:[#allocation5 + $0x60] sm:$0xff]  ;;  %v100_v4 = vld [vmem:[#allocation5 + $0xf8] sm:$0xff]  ;;  %s185_s1 = sshll.u32 %s290_s0, 4  ;;  %s186_s1 = int_to_ptr.vmem [resolvable:$true] %s185_s1 }
   0xd   :  { %v54_v5 = vld [vmem:[#allocation5 + $0x58] sm:$0xff]  ;;  %101 = vmatpush.msra.mxu1 %v100_v4  ;;  %v99_v6 = vld [vmem:[#allocation5 + $0xf0] sm:$0xff]  ;;  %v98_v7 = vld [vmem:[#allocation5 + $0xe8] sm:$0xff]  ;;  %v81_v47 = vand.u32 127, %v80_v44 }
   0xe   :  { %60 = vmatpush.msra.mxu0 %v57_v1  ;;  %v53_v8 = vld [vmem:[#allocation5 + $0x50] sm:$0xff]  ;;  %v97_v9 = vld [vmem:[#allocation5 + $0xe0] sm:$0xff]  ;;  %v52_v10 = vld [vmem:[#allocation5 + $0x48] sm:$0xff] }
   0xf   :  { %102 = vmatpush.msra.mxu1 %v99_v6  ;;  %v96_v11 = vld [vmem:[#allocation5 + $0xd8] sm:$0xff]  ;;  %v51_v12 = vld [vmem:[#allocation5 + $0x40] sm:$0xff]  ;;  %v95_v13 = vld [vmem:[#allocation5 + $0xd0] sm:$0xff]  ;;  %vm82_vm0 = vcmp.eq.s32.totalorder %v81_v47, 25 }
  0x10   :  { %61 = vmatpush.msra.mxu0 %v56_v2  ;;  %v50_v14 = vld [vmem:[#allocation5 + $0x38] sm:$0xff]  ;;  %v94_v15 = vld [vmem:[#allocation5 + $0xc8] sm:$0xff]  ;;  %v49_v16 = vld [vmem:[#allocation5 + $0x30] sm:$0xff] }
  0x11   :  { %103 = vmatpush.msra.mxu1 %v98_v7  ;;  %v93_v17 = vld [vmem:[#allocation5 + $0xc0] sm:$0xff]  ;;  %v48_v18 = vld [vmem:[#allocation5 + $0x28] sm:$0xff]  ;;  %v92_v19 = vld [vmem:[#allocation5 + $0xb8] sm:$0xff] }
  0x12   :  { %62 = vmatpush.msra.mxu0 %v55_v3  ;;  %v47_v20 = vld [vmem:[#allocation5 + $0x20] sm:$0xff]  ;;  %v91_v21 = vld [vmem:[#allocation5 + $0xb0] sm:$0xff]  ;;  %v46_v22 = vld [vmem:[#allocation5 + $0x18] sm:$0xff] }
  0x13   :  { %104 = vmatpush.msra.mxu1 %v97_v9  ;;  %v90_v23 = vld [vmem:[#allocation5 + $0xa8] sm:$0xff]  ;;  %v45_v24 = vld [vmem:[#allocation5 + $0x10] sm:$0xff]  ;;  %v89_v25 = vld [vmem:[#allocation5 + $0xa0] sm:$0xff] }
  0x14   :  { %63 = vmatpush.msra.mxu0 %v54_v5  ;;  %v44_v26 = vld [vmem:[#allocation5 + $0x8] sm:$0xff]  ;;  %v88_v27 = vld [vmem:[#allocation5 + $0x98] sm:$0xff]  ;;  %v43_v28 = vld [vmem:[#allocation5] sm:$0xff] }
  0x15   :  { %105 = vmatpush.msra.mxu1 %v96_v11  ;;  %v42_v29 = vld [vmem:[#allocation2] sm:$0xff]  ;;  %v87_v30 = vld [vmem:[#allocation5 + $0x90] sm:$0xff]  ;;  %v86_v31 = vld [vmem:[#allocation5 + $0x88] sm:$0xff] }
  0x16   :  { %64 = vmatpush.msra.mxu0 %v53_v8  ;;  %v85_v32 = vld [vmem:[#allocation5 + $0x80] sm:$0xff]  ;;  %v139_v33 = vld [vmem:[#allocation5 + $0x178] sm:$0xff]  ;;  %v138_v34 = vld [vmem:[#allocation5 + $0x170] sm:$0xff] }
  0x17   :  { %106 = vmatpush.msra.mxu1 %v95_v13  ;;  %140 = vmatpush.msra.mxu2 %v139_v33  ;;  %v137_v35 = vld [vmem:[#allocation5 + $0x168] sm:$0xff]  ;;  %v136_v36 = vld [vmem:[#allocation5 + $0x160] sm:$0xff]  ;;  %v135_v37 = vld [vmem:[#allocation5 + $0x158] sm:$0xff] }
  0x18   :  { %65 = vmatpush.msra.mxu0 %v52_v10  ;;  %v134_v38 = vld [vmem:[#allocation5 + $0x150] sm:$0xff]  ;;  %v133_v39 = vld [vmem:[#allocation5 + $0x148] sm:$0xff]  ;;  %v132_v40 = vld [vmem:[#allocation5 + $0x140] sm:$0xff] }
  0x19   :  { %107 = vmatpush.msra.mxu1 %v94_v15  ;;  %141 = vmatpush.msra.mxu2 %v138_v34  ;;  %v131_v41 = vld [vmem:[#allocation5 + $0x138] sm:$0xff]  ;;  %v130_v42 = vld [vmem:[#allocation5 + $0x130] sm:$0xff]  ;;  %v129_v43 = vld [vmem:[#allocation5 + $0x128] sm:$0xff] }
  0x1a   :  { %66 = vmatpush.msra.mxu0 %v51_v12  ;;  %v128_v45 = vld [vmem:[#allocation5 + $0x120] sm:$0xff]  ;;  %v127_v46 = vld [vmem:[#allocation5 + $0x118] sm:$0xff]  ;;  %v126_v48 = vld [vmem:[#allocation5 + $0x110] sm:$0xff] }
  0x1b   :  { %108 = vmatpush.msra.mxu1 %v93_v17  ;;  %142 = vmatpush.msra.mxu2 %v137_v35  ;;  %v125_v52 = vld [vmem:[#allocation5 + $0x108] sm:$0xff]  ;;  %v124_v53 = vld [vmem:[#allocation5 + $0x100] sm:$0xff] }
  0x1c   :  { %67 = vmatpush.msra.mxu0 %v50_v14 }
  0x1d   :  { %109 = vmatpush.msra.mxu1 %v92_v19  ;;  %143 = vmatpush.msra.mxu2 %v136_v36 }
  0x1e   :  { %68 = vmatpush.msra.mxu0 %v49_v16 }
  0x1f   :  { %110 = vmatpush.msra.mxu1 %v91_v21  ;;  %144 = vmatpush.msra.mxu2 %v135_v37 }
  0x20   :  { %69 = vmatpush.msra.mxu0 %v48_v18 }
  0x21   :  { %111 = vmatpush.msra.mxu1 %v90_v23  ;;  %145 = vmatpush.msra.mxu2 %v134_v38 }
  0x22   :  { %70 = vmatpush.msra.mxu0 %v47_v20 }
  0x23   :  { %112 = vmatpush.msra.mxu1 %v89_v25  ;;  %146 = vmatpush.msra.mxu2 %v133_v39 }
  0x24   :  { %71 = vmatpush.msra.mxu0 %v46_v22 }
  0x25   :  { %113 = vmatpush.msra.mxu1 %v88_v27  ;;  %147 = vmatpush.msra.mxu2 %v132_v40 }
  0x26   :  { %72 = vmatpush.msra.mxu0 %v45_v24 }
  0x27   :  { %114 = vmatpush.msra.mxu1 %v87_v30  ;;  %148 = vmatpush.msra.mxu2 %v131_v41 }
  0x28   :  { %73 = vmatpush.msra.mxu0 %v44_v26 }
  0x29   :  { %115 = vmatpush.msra.mxu1 %v86_v31  ;;  %149 = vmatpush.msra.mxu2 %v130_v42 }
  0x2a   :  { %74 = vmatpush.msra.mxu0 %v43_v28 }
  0x2b   :  { %75 = vmatmul.f32.vlgmr.msra.gmra.mxu0 %v42_v29  ;;  %116 = vmatpush.msra.mxu1 %v85_v32 }
  0x2c   :  { %150 = vmatpush.msra.mxu2 %v129_v43 }
  0x2e   :  { %151 = vmatpush.msra.mxu2 %v128_v45 }
  0x30   :  { %152 = vmatpush.msra.mxu2 %v127_v46 }
  0x32   :  { %153 = vmatpush.msra.mxu2 %v126_v48 }
  0x34   :  { %154 = vmatpush.msra.mxu2 %v125_v52 }
  0x36   :  { %155 = vmatpush.msra.mxu2 %v124_v53 }
  0xa8   :  { %v76_v49 = vpop.f32.mrf.mxu0 }
  0xa9   :  { %v79_v50 = vmax.f32 %v76_v49, 0.0 }
  0xab   :  { %v83_v51 = vsel %vm82_vm0, 1.0, %v79_v50 }
  0xac   :  { %117 = vmatmul.f32.vlgmr.msra.gmra.mxu1 %v83_v51 }
 0x129   :  { %v118_v54 = vpop.f32.mrf.mxu1 }
 0x12a   :  { %v121_v55 = vmax.f32 %v118_v54, 0.0 }
 0x12c   :  { %v122_v56 = vsel %vm82_vm0, 1.0, %v121_v55 }
 0x12d   :  { %156 = vmatmul.f32.vlgmr.msra.gmra.mxu2 %v122_v56 }
 0x1b0   :  { %v157_v57 = vpop.f32.mrf.mxu2 }
 0x1b1   :  { %v198_v58 = vmul.f32 -1.442695, %v157_v57 }
 0x1b3   :  { %204 = vpow2.f32 %v198_v58 }
 0x1b9   :  { %v205_v59 = vpop.eup %204 }
 0x1ba   :  { %v163_v60 = vadd.f32 1.0, %v205_v59 }
 0x1bc   :  { %206 = vrcp.f32 %v163_v60  ;;  %v175_v0 = vand.u32 2147483648, %v163_v60  ;;  %v173_v2 = vand.u32 2147483647, %v163_v60  ;;  %vm169_vm2 = vweird.f32 %v163_v60 }
 0x1be   :  { %v176_v4 = vor.u32 1.1754944e-38, %v175_v0  ;;  %vm174_vm4 = vcmp.eq.f32.partialorder %v173_v2, 8.507059e+37 }
 0x1c2   :  { %v207_v61 = vpop.eup %206 }
 0x1c3   :  { %v165_v62 = vmul.f32 %v207_v61, %v163_v60  ;;  %vm170_vm1 = vweird.f32 %v207_v61 }
 0x1c4   :  { %vm171_vm3 = vmor %vm169_vm2, %vm170_vm1 }
 0x1c5   :  { %v166_v63 = vsub.f32 1.0, %v165_v62 }
 0x1c7   :  { %v167_v1 = vmul.f32 %v207_v61, %v166_v63 }
 0x1c9   :  { %v168_v3 = vadd.f32 %v207_v61, %v167_v1 }
 0x1cb   :  { %v172_v5 = vsel %vm171_vm3, %v207_v61, %v168_v3 }
 0x1cc   :  { %v177_v6 = vsel %vm174_vm4, %v176_v4, %v172_v5 }
 0x1cd   :  { %179 = vst [vmem:[#allocation7] sm:$0xff] %v177_v6 }
 0x1ce   :  { %190 = dma.vmem_to_hbm [thread:$0]  %s186_s1, 128, %s188_s23, [#allocation4]  }
 0x1cf   :  { %284 = dma.done.wait [#allocation4], 128  }
 0x1d0   :  { %285 = vsyncadd [#allocation4], 4294967168 }
 0x1d1   :  { %195 = vsyncpa [#allocation3], 1 }
 0x1d2   :  { %196 = vsyncpa [#allocation6], 1 }
 0x1d3   :  { %197 = vsyncpa [#allocation4], 1 }

</bundles_post_ra>
